<compile_context>
chip_gen: v5e
topology: v5e:2x2
jax: 0.10.0
libtpu: 0.0.40
codegen_flags: <defaults>
</compile_context>

<pallas_src>
import jax
import jax.numpy as jnp
from jax.experimental import pallas as pl
from jax.experimental.pallas import tpu as pltpu

TM_MAX = 8192  # max spatial (lane) tile for the GEMM


def _round_up(x, m):
    return (x + m - 1) // m * m


# ----------------------------------------------------------------------------
# Pallas kernel: one (batch, M-tile) block of the 1x1x1 conv GEMM.
#   x_ref : (1, Cin, TM)      input dtype (f32), cast to bf16 in-kernel
#   w_ref : (Cout_p, Cin)     bf16, Cout padded to a multiple of 8
#   b_ref : (Cout_p, 1)       f32
#   o_ref : (1, Cout, TM)     f32, lane-dense along TM
# ----------------------------------------------------------------------------
def _outconv1x1_kernel(x_ref, w_ref, b_ref, o_ref):
    a = x_ref[0].astype(jnp.bfloat16)                                   # (Cin, TM)
    acc = jnp.dot(w_ref[...], a, preferred_element_type=jnp.float32)    # (Cout_p, TM)
    acc = acc + b_ref[...]                                               # f32 bias
    cout = o_ref.shape[1]
    o_ref[0] = acc[:cout].astype(o_ref.dtype)


def out_conv3d(x, w, b, *, tm_max=TM_MAX):
    """OutConv forward: 1x1x1 Conv3d.

    x: (B, Cin, D, H, W) float32
    w: (Cout, Cin, 1, 1, 1)
    b: (Cout,)
    returns (B, Cout, D, H, W) float32
    """
    B, Cin, D, H, W = x.shape
    Cout = w.shape[0]
    assert w.shape == (Cout, Cin, 1, 1, 1)

    S = D * H * W
    x_r = x.reshape(B, Cin, S)

    # Pick a large, 128-aligned M tile; keep >= 2 grid blocks when possible so
    # both v7x TensorCores get work.
    TM = min(tm_max, _round_up(S, 128))
    if B * pl.cdiv(S, TM) < 2 and TM > 128:
        TM = _round_up(TM // 2, 128)
    Sp = _round_up(S, TM)
    if Sp != S:
        x_r = jnp.pad(x_r, ((0, 0), (0, 0), (0, Sp - S)))

    # Pad Cout to one sublane group; weight in bf16 (MXU native), bias in f32.
    Cout_p = _round_up(Cout, 8)
    w_p = jnp.zeros((Cout_p, Cin), jnp.bfloat16).at[:Cout].set(
        w.reshape(Cout, Cin).astype(jnp.bfloat16))
    b_p = jnp.zeros((Cout_p, 1), jnp.float32).at[:Cout, 0].set(
        b.astype(jnp.float32))

    grid = (B, Sp // TM)
    out = pl.pallas_call(
        _outconv1x1_kernel,
        out_shape=jax.ShapeDtypeStruct((B, Cout, Sp), jnp.float32),
        grid=grid,
        in_specs=[
            pl.BlockSpec((1, Cin, TM), lambda bi, mi: (bi, 0, mi)),   # input tile
            pl.BlockSpec((Cout_p, Cin), lambda bi, mi: (0, 0)),       # full weight
            pl.BlockSpec((Cout_p, 1), lambda bi, mi: (0, 0)),         # bias
        ],
        out_specs=pl.BlockSpec((1, Cout, TM), lambda bi, mi: (bi, 0, mi)),
        compiler_params=pltpu.CompilerParams(
            dimension_semantics=("parallel", "parallel"),
            vmem_limit_bytes=32 * 1024 * 1024,
        ),
    )(x_r, w_p, b_p)

    return out[:, :, :S].reshape(B, Cout, D, H, W)


# ----------------------------------------------------------------------------
if __name__ == "__main__":
    key = jax.random.PRNGKey(0)
    kx, kw, kb = jax.random.split(key, 3)

    # Small shapes consistent with OutConv's use in the VAE (Cin=32 -> Cout=1).
    B, Cin, Cout, D, H, W = 2, 32, 1, 16, 16, 16
    x = jax.random.normal(kx, (B, Cin, D, H, W), jnp.float32)
    w = jax.random.normal(kw, (Cout, Cin, 1, 1, 1), jnp.float32) * (1.0 / Cin) ** 0.5
    bias = jax.random.normal(kb, (Cout,), jnp.float32) * 0.1

    fwd = jax.jit(out_conv3d)
    y = fwd(x, w, bias)
    jax.block_until_ready(y)

    # Pure-JAX f32 reference (bf16 MXU inputs -> allow ~1e-2 relative error).
    ref = (jnp.einsum("bcdhw,oc->bodhw", x, w.reshape(Cout, Cin))
           + bias.reshape(1, Cout, 1, 1, 1))
    assert y.shape == (B, Cout, D, H, W), y.shape
    rel_err = float(jnp.max(jnp.abs(y - ref)) / (jnp.max(jnp.abs(ref)) + 1e-6))
    assert bool(jnp.all(jnp.isfinite(y)))
    assert rel_err < 2e-2, rel_err
    print("KERNEL_OK")
</pallas_src>

<mosaic_0001>
module attributes {stable_mosaic.version = 11 : i64} {
  func.func @_outconv1x1_kernel(%arg0: i32, %arg1: i32, %arg2: memref<1x32x4096xf32, #tpu.memory_space<vmem>>, %arg3: memref<8x32xbf16, #tpu.memory_space<vmem>>, %arg4: memref<8x1xf32, #tpu.memory_space<vmem>>, %arg5: memref<1x1x4096xf32, #tpu.memory_space<vmem>>) attributes {dimension_semantics = [#tpu.dimension_semantics<parallel>, #tpu.dimension_semantics<parallel>], iteration_bounds = array<i64: 2, 1>, scalar_prefetch = 0 : i64, scratch_operands = 0 : i64, tpu.core_type = #tpu.core_type<tc>, window_params = [{transform_indices = @transform_0, window_bounds = array<i64: 1, 32, 4096>}, {pipeline_mode = #tpu.pipeline_mode<synchronous>, transform_indices = @transform_1, window_bounds = array<i64: 8, 32>}, {pipeline_mode = #tpu.pipeline_mode<synchronous>, transform_indices = @transform_2, window_bounds = array<i64: 8, 1>}, {transform_indices = @transform_3, window_bounds = array<i64: 1, 1, 4096>}]} {
    %c0 = arith.constant 0 : index
    %c0_0 = arith.constant 0 : index
    %c0_1 = arith.constant 0 : index
    %0 = vector.load %arg2[%c0, %c0_0, %c0_1] : memref<1x32x4096xf32, #tpu.memory_space<vmem>>, vector<1x32x4096xf32>
    %1 = vector.shape_cast %0 : vector<1x32x4096xf32> to vector<32x4096xf32>
    %2 = arith.truncf %1 : vector<32x4096xf32> to vector<32x4096xbf16>
    %c0_2 = arith.constant 0 : index
    %c0_3 = arith.constant 0 : index
    %3 = vector.load %arg3[%c0_2, %c0_3] : memref<8x32xbf16, #tpu.memory_space<vmem>>, vector<8x32xbf16>
    %cst = arith.constant dense<0.000000e+00> : vector<8x4096xf32>
    %4 = tpu.matmul %3, %2, %cst {dimension_numbers = #tpu.dot_dimension_numbers<[1], [0], [0], [1], [0, 0, 1, 1], [], []>} : vector<8x32xbf16>, vector<32x4096xbf16>, vector<8x4096xf32> -> vector<8x4096xf32>
    %c0_4 = arith.constant 0 : index
    %c0_5 = arith.constant 0 : index
    %5 = vector.load %arg4[%c0_4, %c0_5] : memref<8x1xf32, #tpu.memory_space<vmem>>, vector<8x1xf32>
    %6 = vector.broadcast %5 : vector<8x1xf32> to vector<8x4096xf32>
    %7 = arith.addf %4, %6 : vector<8x4096xf32>
    %8 = vector.extract_strided_slice %7 {offsets = [0, 0], sizes = [1, 4096], strides = [1, 1]} : vector<8x4096xf32> to vector<1x4096xf32>
    %c0_6 = arith.constant 0 : index
    %c0_7 = arith.constant 0 : index
    %c0_8 = arith.constant 0 : index
    %9 = vector.load %arg5[%c0_6, %c0_7, %c0_8] : memref<1x1x4096xf32, #tpu.memory_space<vmem>>, vector<1x1x4096xf32>
    %10 = vector.shape_cast %9 : vector<1x1x4096xf32> to vector<1x4096xf32>
    %11 = vector.shape_cast %8 : vector<1x4096xf32> to vector<1x1x4096xf32>
    tpu.vector_store %arg5[%c0_6, %c0_7, %c0_8], %11 {strides = array<i32>} : memref<1x1x4096xf32, #tpu.memory_space<vmem>>, vector<1x1x4096xf32>,
    return
  }
  func.func @transform_0(%arg0: i32, %arg1: i32) -> (i32, i32, i32) {
    %c0_i32 = arith.constant 0 : i32
    %c0_i32_0 = arith.constant 0 : i32
    return %arg0, %c0_i32, %arg1 : i32, i32, i32
  }
  func.func @transform_1(%arg0: i32, %arg1: i32) -> (i32, i32) {
    %c0_i32 = arith.constant 0 : i32
    %c0_i32_0 = arith.constant 0 : i32
    %c0_i32_1 = arith.constant 0 : i32
    return %c0_i32, %c0_i32_0 : i32, i32
  }
  func.func @transform_2(%arg0: i32, %arg1: i32) -> (i32, i32) {
    %c0_i32 = arith.constant 0 : i32
    %c0_i32_0 = arith.constant 0 : i32
    %c0_i32_1 = arith.constant 0 : i32
    return %c0_i32, %c0_i32_0 : i32, i32
  }
  func.func @transform_3(%arg0: i32, %arg1: i32) -> (i32, i32, i32) {
    %c0_i32 = arith.constant 0 : i32
    %c0_i32_0 = arith.constant 0 : i32
    return %arg0, %c0_i32, %arg1 : i32, i32, i32
  }
}

</mosaic_0001>

<bundles_post_ra>
// kernel: out_conv3d.1
= control target key start
LH: loop header
LB: loop body
LE: loop exit
PB: predicated region body
PF: predicated region fallthrough
CT: control target
= control target key end

     0   :  { %s1126_s12 = smov 0   ;;  %s1128_s13 = smov 0   ;;  %s1433_s0 = inlined_call_operand.vmem [shape: f32[2,32,4096], index: 0, kind: input, shape index: {}]   ;;  %s1434_s1 = inlined_call_operand.vmem [shape: bf16[8,32], index: 1, kind: input, shape index: {}]   ;;  %s1435_s2 = inlined_call_operand.vmem [shape: f32[8,1], index: 2, kind: input, shape index: {}]   ;;  %s1436_s3 = inlined_call_operand.vmem [shape: f32[2,1,4096], index: 3, kind: output, shape index: {}]  }
   0x1   :  { %s1130_s14 = smov 0  }
   0x2 LB: > { %s25_s15 = sadd.s32 1, %s1099_s13  ;;  %p1016_p0 = scmp.ge.s32.totalorder %s1103_s14, 1  ;;  %s1103_s14 = sphi %s1130_s14, %s13_s14   ;;  %s1099_s13 = sphi %s1128_s13, %s1438_s13   ;;  %s1095_s12 = sphi %s1126_s12, %s1437_s12  }
   0x3   : > { %p27_p1 = scmp.ge.s32.totalorder %s25_s15, 2  ;;  %p158_p2 = scmp.lt.s32.totalorder %s1103_s14, 3 }
   0x5   : > { %s1440_s15 = smov (%p27_p1, %s25_s15), 0  ;;  %p159_p3 = pnand %p1016_p0, %p158_p2 }
   0x6   : > { %p190_p4 = scmp.lt.s32.totalorder (!%p159_p3), %s1095_s12, 1 }
   0x7   : > { %162 = sbr.rel (%p159_p3) target bundleno = 280 (0x118), region = 32 }
   0xc   : > { %v402_v0 = vld [vmem:[%s1435_s2] sm:$0xff]  ;;  %v1105_v1 = vmov 0   ;;  %s1442_s12 = smov (!%p190_p4, %s1095_s12), 1  ;;  %vm408_vm0 = vcmask 261120   ;;  %vm890_vm1 = vcmask 1042434   ;;  %vm894_vm2 = vcmask 1044484  }
   0xd   : > { %1080 = vset.pattern.permute.xlu0 %v1105_v1  ;;  %s1054_s18 = sshll.u32 %s1442_s12, 10  ;;  %v1174_v25 = vld [vmem:[%s1434_s1] sm:$0xf]  ;;  %vm888_vm3 = vcmask 1040384   ;;  %vm892_vm4 = vcmask 1041408   ;;  %s1019_s24 = sshll.u32 %s1442_s12, 5 }
   0xe   : > { %405 = vperm.xlu0 %1080, %v402_v0   ;;  %s1153_s21 = scalar_lea.vmem %s1433_s0, %s1054_s18  ;;  %vm896_vm5 = vcmask 1046534   ;;  %vm898_vm6 = vcmask 1045508   ;;  %vm900_vm7 = vcmask 1043456   ;;  %s1369_s27 = scalar_lea.vmem %s1436_s3, %s1019_s24 }
   0xf   : > { %v273_v2 = vld [vmem:[%s1153_s21 + $0x200] sm:$0xff]  ;;  %v274_v4 = vld [vmem:[%s1153_s21 + $0x208] sm:$0xff]  ;;  %v275_v7 = vld [vmem:[%s1153_s21 + $0x210] sm:$0xff] }
  0x10   : > { %v305_v3 = vld [vmem:[%s1153_s21 + $0x300] sm:$0xff]  ;;  %v306_v6 = vld [vmem:[%s1153_s21 + $0x308] sm:$0xff]  ;;  %v307_v8 = vld [vmem:[%s1153_s21 + $0x310] sm:$0xff] }
  0x11   : > { %v369_v5 = vpack.c.bf16 %v305_v3, %v273_v2  ;;  %v370_v9 = vpack.c.bf16 %v306_v6, %v274_v4  ;;  %v371_v10 = vpack.c.bf16 %v307_v8, %v275_v7  ;;  %v276_v11 = vld [vmem:[%s1153_s21 + $0x218] sm:$0xff]  ;;  %v209_v13 = vld [vmem:[%s1153_s21] sm:$0xff]  ;;  %v210_v16 = vld [vmem:[%s1153_s21 + $0x8] sm:$0xff] }
  0x12   : > { %v308_v12 = vld [vmem:[%s1153_s21 + $0x318] sm:$0xff]  ;;  %v241_v15 = vld [vmem:[%s1153_s21 + $0x100] sm:$0xff]  ;;  %v242_v17 = vld [vmem:[%s1153_s21 + $0x108] sm:$0xff] }
  0x13   : > { %418 = vmatpush.bf16.msra.mxu0 %v369_v5  ;;  %v372_v14 = vpack.c.bf16 %v308_v12, %v276_v11  ;;  %431 = vmatpush.bf16.msra.mxu1 %v370_v9  ;;  %v337_v18 = vpack.c.bf16 %v241_v15, %v209_v13  ;;  %v338_v19 = vpack.c.bf16 %v242_v17, %v210_v16  ;;  %v211_v20 = vld [vmem:[%s1153_s21 + $0x10] sm:$0xff]  ;;  %v212_v22 = vld [vmem:[%s1153_s21 + $0x18] sm:$0xff]  ;;  %v277_v32 = vld [vmem:[%s1153_s21 + $0x220] sm:$0xff] }
  0x14   : > { %444 = vmatpush.bf16.msra.mxu2 %v371_v10  ;;  %v243_v21 = vld [vmem:[%s1153_s21 + $0x110] sm:$0xff]  ;;  %v244_v24 = vld [vmem:[%s1153_s21 + $0x118] sm:$0xff]  ;;  %v309_v34 = vld [vmem:[%s1153_s21 + $0x320] sm:$0xff] }
  0x15   : > { %457 = vmatpush.bf16.msra.mxu3 %v372_v14  ;;  %v339_v23 = vpack.c.bf16 %v243_v21, %v211_v20  ;;  %v279_v26 = vld [vmem:[%s1153_s21 + $0x230] sm:$0xff]  ;;  %v340_v28 = vpack.c.bf16 %v244_v24, %v212_v22  ;;  %v280_v30 = vld [vmem:[%s1153_s21 + $0x238] sm:$0xff]  ;;  %v278_v35 = vld [vmem:[%s1153_s21 + $0x228] sm:$0xff]  ;;  %v373_v37 = vpack.c.bf16 %v309_v34, %v277_v32 }
  0x16   : > { %v311_v27 = vld [vmem:[%s1153_s21 + $0x330] sm:$0xff]  ;;  %v312_v31 = vld [vmem:[%s1153_s21 + $0x338] sm:$0xff]  ;;  %v310_v36 = vld [vmem:[%s1153_s21 + $0x328] sm:$0xff] }
  0x17   : > { %v375_v29 = vpack.c.bf16 %v311_v27, %v279_v26  ;;  %419 = vmatpush.bf16.msra.mxu0 %v337_v18  ;;  %v376_v33 = vpack.c.bf16 %v312_v31, %v280_v30  ;;  %432 = vmatpush.bf16.msra.mxu1 %v338_v19  ;;  %v215_v38 = vld [vmem:[%s1153_s21 + $0x30] sm:$0xff]  ;;  %v216_v40 = vld [vmem:[%s1153_s21 + $0x38] sm:$0xff]  ;;  %v374_v41 = vpack.c.bf16 %v310_v36, %v278_v35  ;;  %v213_v44 = vld [vmem:[%s1153_s21 + $0x20] sm:$0xff] }
  0x18   : > { %445 = vmatpush.bf16.msra.mxu2 %v339_v23  ;;  %v247_v39 = vld [vmem:[%s1153_s21 + $0x130] sm:$0xff]  ;;  %v248_v43 = vld [vmem:[%s1153_s21 + $0x138] sm:$0xff]  ;;  %v245_v45 = vld [vmem:[%s1153_s21 + $0x120] sm:$0xff] }
  0x19   : > { %458 = vmatpush.bf16.msra.mxu3 %v340_v28  ;;  %v343_v42 = vpack.c.bf16 %v247_v39, %v215_v38  ;;  %v344_v46 = vpack.c.bf16 %v248_v43, %v216_v40  ;;  %v214_v47 = vld [vmem:[%s1153_s21 + $0x28] sm:$0xff]  ;;  %v283_v49 = vld [vmem:[%s1153_s21 + $0x250] sm:$0xff]  ;;  %v284_v51 = vld [vmem:[%s1153_s21 + $0x258] sm:$0xff]  ;;  %v341_v53 = vpack.c.bf16 %v245_v45, %v213_v44 }
  0x1a   : > { %1020 = vmatmul.msk.bf16.vlgmr.msra.gmra.mxu0 %vm408_vm0, %v1174_v25  ;;  %v246_v48 = vld [vmem:[%s1153_s21 + $0x128] sm:$0xff]  ;;  %1021 = vmatmul.msk.bf16.vlgmr.msra.gmra.mxu1 %vm408_vm0, %v1174_v25  ;;  %v315_v50 = vld [vmem:[%s1153_s21 + $0x350] sm:$0xff]  ;;  %v316_v52 = vld [vmem:[%s1153_s21 + $0x358] sm:$0xff] }
  0x1b   : > { %1022 = vmatmul.msk.bf16.vlgmr.msra.gmra.mxu2 %vm408_vm0, %v1174_v25  ;;  %470 = vmatpush.bf16.msrb.mxu0 %v373_v37  ;;  %v379_v54 = vpack.c.bf16 %v315_v50, %v283_v49  ;;  %v380_v55 = vpack.c.bf16 %v316_v52, %v284_v51  ;;  %v281_v56 = vld [vmem:[%s1153_s21 + $0x240] sm:$0xff]  ;;  %v282_v58 = vld [vmem:[%s1153_s21 + $0x248] sm:$0xff]  ;;  %v342_v59 = vpack.c.bf16 %v246_v48, %v214_v47  ;;  %v219_v62 = vld [vmem:[%s1153_s21 + $0x50] sm:$0xff] }
  0x1c   : > { %496 = vmatpush.bf16.msrb.mxu2 %v375_v29  ;;  %1023 = vmatmul.msk.bf16.vlgmr.msra.gmra.mxu3 %vm408_vm0, %v1174_v25  ;;  %v313_v57 = vld [vmem:[%s1153_s21 + $0x340] sm:$0xff]  ;;  %v314_v61 = vld [vmem:[%s1153_s21 + $0x348] sm:$0xff]  ;;  %v251_v63 = vld [vmem:[%s1153_s21 + $0x150] sm:$0xff] }
  0x1d   : > { %509 = vmatpush.bf16.msrb.mxu3 %v376_v33  ;;  %483 = vmatpush.bf16.msrb.mxu1 %v374_v41  ;;  %v377_v60 = vpack.c.bf16 %v313_v57, %v281_v56  ;;  %v378_v0 = vpack.c.bf16 %v314_v61, %v282_v58  ;;  %v347_v1 = vpack.c.bf16 %v251_v63, %v219_v62  ;;  %v220_v2 = vld [vmem:[%s1153_s21 + $0x58] sm:$0xff]  ;;  %v217_v4 = vld [vmem:[%s1153_s21 + $0x40] sm:$0xff]  ;;  %v218_v7 = vld [vmem:[%s1153_s21 + $0x48] sm:$0xff] }
  0x1e   : > { %v252_v3 = vld [vmem:[%s1153_s21 + $0x158] sm:$0xff]  ;;  %v249_v6 = vld [vmem:[%s1153_s21 + $0x140] sm:$0xff]  ;;  %v250_v8 = vld [vmem:[%s1153_s21 + $0x148] sm:$0xff] }
  0x1f   : > { %v348_v5 = vpack.c.bf16 %v252_v3, %v220_v2  ;;  %471 = vmatpush.bf16.msrb.mxu0 %v341_v53  ;;  %v345_v9 = vpack.c.bf16 %v249_v6, %v217_v4  ;;  %v346_v10 = vpack.c.bf16 %v250_v8, %v218_v7  ;;  %v287_v11 = vld [vmem:[%s1153_s21 + $0x270] sm:$0xff]  ;;  %v288_v13 = vld [vmem:[%s1153_s21 + $0x278] sm:$0xff]  ;;  %v285_v15 = vld [vmem:[%s1153_s21 + $0x260] sm:$0xff] }
  0x20   : > { %497 = vmatpush.bf16.msrb.mxu2 %v343_v42  ;;  %v319_v12 = vld [vmem:[%s1153_s21 + $0x370] sm:$0xff]  ;;  %v320_v14 = vld [vmem:[%s1153_s21 + $0x378] sm:$0xff]  ;;  %v317_v16 = vld [vmem:[%s1153_s21 + $0x360] sm:$0xff] }
  0x21   : > { %510 = vmatpush.bf16.msrb.mxu3 %v344_v46  ;;  %484 = vmatpush.bf16.msrb.mxu1 %v342_v59  ;;  %v286_v17 = vld [vmem:[%s1153_s21 + $0x268] sm:$0xff]  ;;  %v383_v19 = vpack.c.bf16 %v319_v12, %v287_v11  ;;  %v384_v20 = vpack.c.bf16 %v320_v14, %v288_v13  ;;  %v381_v21 = vpack.c.bf16 %v317_v16, %v285_v15  ;;  %v223_v22 = vld [vmem:[%s1153_s21 + $0x70] sm:$0xff]  ;;  %v224_v24 = vld [vmem:[%s1153_s21 + $0x78] sm:$0xff] }
  0x22   : > { %v318_v18 = vld [vmem:[%s1153_s21 + $0x368] sm:$0xff]  ;;  %v255_v23 = vld [vmem:[%s1153_s21 + $0x170] sm:$0xff]  ;;  %v256_v27 = vld [vmem:[%s1153_s21 + $0x178] sm:$0xff] }
  0x23   : > { %522 = vmatpush.bf16.msra.mxu0 %v377_v60  ;;  %v382_v26 = vpack.c.bf16 %v318_v18, %v286_v17  ;;  %v221_v28 = vld [vmem:[%s1153_s21 + $0x60] sm:$0xff]  ;;  %v222_v30 = vld [vmem:[%s1153_s21 + $0x68] sm:$0xff]  ;;  %v351_v32 = vpack.c.bf16 %v255_v23, %v223_v22  ;;  %v352_v33 = vpack.c.bf16 %v256_v27, %v224_v24  ;;  %v291_v36 = vld [vmem:[%s1153_s21 + $0x290] sm:$0xff] }
  0x24   : > { %548 = vmatpush.bf16.msra.mxu2 %v379_v54  ;;  %v253_v29 = vld [vmem:[%s1153_s21 + $0x160] sm:$0xff]  ;;  %v254_v31 = vld [vmem:[%s1153_s21 + $0x168] sm:$0xff]  ;;  %v323_v37 = vld [vmem:[%s1153_s21 + $0x390] sm:$0xff] }
  0x25   : > { %561 = vmatpush.bf16.msra.mxu3 %v380_v55  ;;  %535 = vmatpush.bf16.msra.mxu1 %v378_v0  ;;  %v349_v34 = vpack.c.bf16 %v253_v29, %v221_v28  ;;  %v350_v35 = vpack.c.bf16 %v254_v31, %v222_v30  ;;  %v292_v38 = vld [vmem:[%s1153_s21 + $0x298] sm:$0xff]  ;;  %v289_v40 = vld [vmem:[%s1153_s21 + $0x280] sm:$0xff]  ;;  %v290_v42 = vld [vmem:[%s1153_s21 + $0x288] sm:$0xff]  ;;  %v387_v44 = vpack.c.bf16 %v323_v37, %v291_v36 }
  0x26   : > { %v324_v39 = vld [vmem:[%s1153_s21 + $0x398] sm:$0xff]  ;;  %v321_v41 = vld [vmem:[%s1153_s21 + $0x380] sm:$0xff]  ;;  %v322_v43 = vld [vmem:[%s1153_s21 + $0x388] sm:$0xff] }
  0x27   : > { %523 = vmatpush.bf16.msra.mxu0 %v345_v9  ;;  %v388_v45 = vpack.c.bf16 %v324_v39, %v292_v38  ;;  %v385_v46 = vpack.c.bf16 %v321_v41, %v289_v40  ;;  %v227_v47 = vld [vmem:[%s1153_s21 + $0x90] sm:$0xff]  ;;  %v228_v49 = vld [vmem:[%s1153_s21 + $0x98] sm:$0xff]  ;;  %v386_v50 = vpack.c.bf16 %v322_v43, %v290_v42  ;;  %v225_v52 = vld [vmem:[%s1153_s21 + $0x80] sm:$0xff] }
  0x28   : > { %549 = vmatpush.bf16.msra.mxu2 %v347_v1  ;;  %v259_v48 = vld [vmem:[%s1153_s21 + $0x190] sm:$0xff]  ;;  %v260_v51 = vld [vmem:[%s1153_s21 + $0x198] sm:$0xff]  ;;  %v257_v53 = vld [vmem:[%s1153_s21 + $0x180] sm:$0xff] }
  0x29   : > { %562 = vmatpush.bf16.msra.mxu3 %v348_v5  ;;  %536 = vmatpush.bf16.msra.mxu1 %v346_v10  ;;  %v226_v54 = vld [vmem:[%s1153_s21 + $0x88] sm:$0xff]  ;;  %v355_v56 = vpack.c.bf16 %v259_v48, %v227_v47  ;;  %v356_v57 = vpack.c.bf16 %v260_v51, %v228_v49  ;;  %v353_v58 = vpack.c.bf16 %v257_v53, %v225_v52  ;;  %v295_v60 = vld [vmem:[%s1153_s21 + $0x2b0] sm:$0xff]  ;;  %v296_v62 = vld [vmem:[%s1153_s21 + $0x2b8] sm:$0xff] }
  0x2a   : > { %1024 = vmatmul.msk.bf16.vlgmr.msrb.gmra.mxu0 %vm408_vm0, %v1174_v25  ;;  %1025 = vmatmul.msk.bf16.vlgmr.msrb.gmra.mxu1 %vm408_vm0, %v1174_v25  ;;  %v258_v55 = vld [vmem:[%s1153_s21 + $0x188] sm:$0xff]  ;;  %v327_v61 = vld [vmem:[%s1153_s21 + $0x3b0] sm:$0xff]  ;;  %v328_v63 = vld [vmem:[%s1153_s21 + $0x3b8] sm:$0xff] }
  0x2b   : > { %1026 = vmatmul.msk.bf16.vlgmr.msrb.gmra.mxu2 %vm408_vm0, %v1174_v25  ;;  %574 = vmatpush.bf16.msrb.mxu0 %v381_v21  ;;  %v354_v59 = vpack.c.bf16 %v258_v55, %v226_v54  ;;  %v293_v0 = vld [vmem:[%s1153_s21 + $0x2a0] sm:$0xff]  ;;  %v294_v2 = vld [vmem:[%s1153_s21 + $0x2a8] sm:$0xff]  ;;  %v391_v4 = vpack.c.bf16 %v327_v61, %v295_v60  ;;  %v392_v5 = vpack.c.bf16 %v328_v63, %v296_v62  ;;  %v231_v7 = vld [vmem:[%s1153_s21 + $0xb0] sm:$0xff] }
  0x2c   : > { %1027 = vmatmul.msk.bf16.vlgmr.msrb.gmra.mxu3 %vm408_vm0, %v1174_v25  ;;  %600 = vmatpush.bf16.msrb.mxu2 %v383_v19  ;;  %v325_v1 = vld [vmem:[%s1153_s21 + $0x3a0] sm:$0xff]  ;;  %v326_v3 = vld [vmem:[%s1153_s21 + $0x3a8] sm:$0xff]  ;;  %v263_v8 = vld [vmem:[%s1153_s21 + $0x1b0] sm:$0xff] }
  0x2d   : > { %613 = vmatpush.bf16.msrb.mxu3 %v384_v20  ;;  %587 = vmatpush.bf16.msrb.mxu1 %v382_v26  ;;  %v389_v6 = vpack.c.bf16 %v325_v1, %v293_v0  ;;  %v232_v9 = vld [vmem:[%s1153_s21 + $0xb8] sm:$0xff]  ;;  %v390_v10 = vpack.c.bf16 %v326_v3, %v294_v2  ;;  %v229_v12 = vld [vmem:[%s1153_s21 + $0xa0] sm:$0xff]  ;;  %v230_v14 = vld [vmem:[%s1153_s21 + $0xa8] sm:$0xff]  ;;  %v359_v16 = vpack.c.bf16 %v263_v8, %v231_v7 }
  0x2e   : > { %v264_v11 = vld [vmem:[%s1153_s21 + $0x1b8] sm:$0xff]  ;;  %v261_v13 = vld [vmem:[%s1153_s21 + $0x1a0] sm:$0xff]  ;;  %v262_v15 = vld [vmem:[%s1153_s21 + $0x1a8] sm:$0xff] }
  0x2f   : > { %575 = vmatpush.bf16.msrb.mxu0 %v349_v34  ;;  %v360_v17 = vpack.c.bf16 %v264_v11, %v232_v9  ;;  %v357_v18 = vpack.c.bf16 %v261_v13, %v229_v12  ;;  %v358_v19 = vpack.c.bf16 %v262_v15, %v230_v14  ;;  %v299_v20 = vld [vmem:[%s1153_s21 + $0x2d0] sm:$0xff]  ;;  %v300_v22 = vld [vmem:[%s1153_s21 + $0x2d8] sm:$0xff]  ;;  %v297_v24 = vld [vmem:[%s1153_s21 + $0x2c0] sm:$0xff] }
  0x30   : > { %601 = vmatpush.bf16.msrb.mxu2 %v351_v32  ;;  %v331_v21 = vld [vmem:[%s1153_s21 + $0x3d0] sm:$0xff]  ;;  %v332_v23 = vld [vmem:[%s1153_s21 + $0x3d8] sm:$0xff]  ;;  %v329_v26 = vld [vmem:[%s1153_s21 + $0x3c0] sm:$0xff] }
  0x31   : > { %614 = vmatpush.bf16.msrb.mxu3 %v352_v33  ;;  %588 = vmatpush.bf16.msrb.mxu1 %v350_v35  ;;  %v298_v27 = vld [vmem:[%s1153_s21 + $0x2c8] sm:$0xff]  ;;  %v395_v29 = vpack.c.bf16 %v331_v21, %v299_v20  ;;  %v396_v30 = vpack.c.bf16 %v332_v23, %v300_v22  ;;  %v393_v31 = vpack.c.bf16 %v329_v26, %v297_v24  ;;  %v235_v32 = vld [vmem:[%s1153_s21 + $0xd0] sm:$0xff]  ;;  %v236_v34 = vld [vmem:[%s1153_s21 + $0xd8] sm:$0xff] }
  0x32   : > { %v330_v28 = vld [vmem:[%s1153_s21 + $0x3c8] sm:$0xff]  ;;  %v267_v33 = vld [vmem:[%s1153_s21 + $0x1d0] sm:$0xff]  ;;  %v268_v36 = vld [vmem:[%s1153_s21 + $0x1d8] sm:$0xff] }
  0x33   : > { %v394_v35 = vpack.c.bf16 %v330_v28, %v298_v27  ;;  %v233_v37 = vld [vmem:[%s1153_s21 + $0xc0] sm:$0xff]  ;;  %v234_v39 = vld [vmem:[%s1153_s21 + $0xc8] sm:$0xff]  ;;  %v363_v41 = vpack.c.bf16 %v267_v33, %v235_v32  ;;  %v364_v42 = vpack.c.bf16 %v268_v36, %v236_v34  ;;  %v304_v47 = vld [vmem:[%s1153_s21 + $0x2f8] sm:$0xff] }
  0x34   : > { %v265_v38 = vld [vmem:[%s1153_s21 + $0x1c0] sm:$0xff]  ;;  %v266_v40 = vld [vmem:[%s1153_s21 + $0x1c8] sm:$0xff]  ;;  %v336_v48 = vld [vmem:[%s1153_s21 + $0x3f8] sm:$0xff] }
  0x35   : > { %v361_v43 = vpack.c.bf16 %v265_v38, %v233_v37  ;;  %v301_v49 = vld [vmem:[%s1153_s21 + $0x2e0] sm:$0xff]  ;;  %v302_v51 = vld [vmem:[%s1153_s21 + $0x2e8] sm:$0xff]  ;;  %v400_v54 = vpack.c.bf16 %v336_v48, %v304_v47  ;;  %v272_v60 = vld [vmem:[%s1153_s21 + $0x1f8] sm:$0xff] }
  0x36   : > { %v334_v52 = vld [vmem:[%s1153_s21 + $0x3e8] sm:$0xff]  ;;  %v237_v61 = vld [vmem:[%s1153_s21 + $0xe0] sm:$0xff] }
  0x37   : > { %v269_v62 = vld [vmem:[%s1153_s21 + $0x1e0] sm:$0xff]  ;;  %v238_v63 = vld [vmem:[%s1153_s21 + $0xe8] sm:$0xff] }
  0x38   : > { %v270_v0 = vld [vmem:[%s1153_s21 + $0x1e8] sm:$0xff]  ;;  %v365_v3 = vpack.c.bf16 %v269_v62, %v237_v61 }
  0x3a   : > { %1028 = vmatmul.msk.bf16.vlgmr.msra.gmra.mxu0 %vm408_vm0, %v1174_v25  ;;  %1029 = vmatmul.msk.bf16.vlgmr.msra.gmra.mxu1 %vm408_vm0, %v1174_v25 }
  0x3b   : > { %1030 = vmatmul.msk.bf16.vlgmr.msra.gmra.mxu2 %vm408_vm0, %v1174_v25  ;;  %626 = vmatpush.bf16.msra.mxu0 %v385_v46  ;;  %v335_v46 = vld [vmem:[%s1153_s21 + $0x3f0] sm:$0xff] }
  0x3c   : > { %1031 = vmatmul.msk.bf16.vlgmr.msra.gmra.mxu3 %vm408_vm0, %v1174_v25  ;;  %652 = vmatpush.bf16.msra.mxu2 %v387_v44  ;;  %v362_v44 = vpack.c.bf16 %v266_v40, %v234_v39 }
  0x3d   : > { %665 = vmatpush.bf16.msra.mxu3 %v388_v45  ;;  %639 = vmatpush.bf16.msra.mxu1 %v386_v50  ;;  %v303_v45 = vld [vmem:[%s1153_s21 + $0x2f0] sm:$0xff]  ;;  %v333_v50 = vld [vmem:[%s1153_s21 + $0x3e0] sm:$0xff] }
  0x3e   : > { %v399_v53 = vpack.c.bf16 %v335_v46, %v303_v45  ;;  %v397_v55 = vpack.c.bf16 %v333_v50, %v301_v49 }
  0x3f   : > { %627 = vmatpush.bf16.msra.mxu0 %v353_v58  ;;  %v240_v58 = vld [vmem:[%s1153_s21 + $0xf8] sm:$0xff] }
  0x40   : > { %653 = vmatpush.bf16.msra.mxu2 %v355_v56  ;;  %v239_v56 = vld [vmem:[%s1153_s21 + $0xf0] sm:$0xff]  ;;  %v368_v2 = vpack.c.bf16 %v272_v60, %v240_v58 }
  0x41   : > { %666 = vmatpush.bf16.msra.mxu3 %v356_v57  ;;  %640 = vmatpush.bf16.msra.mxu1 %v354_v59  ;;  %v271_v57 = vld [vmem:[%s1153_s21 + $0x1f0] sm:$0xff]  ;;  %v398_v59 = vpack.c.bf16 %v334_v52, %v302_v51 }
  0x42   : > { %v367_v1 = vpack.c.bf16 %v271_v57, %v239_v56 }
  0x4a   : > { %1032 = vmatmul.msk.bf16.vlgmr.msrb.gmra.mxu0 %vm408_vm0, %v1174_v25  ;;  %1033 = vmatmul.msk.bf16.vlgmr.msrb.gmra.mxu1 %vm408_vm0, %v1174_v25 }
  0x4b   : > { %1034 = vmatmul.msk.bf16.vlgmr.msrb.gmra.mxu2 %vm408_vm0, %v1174_v25  ;;  %678 = vmatpush.bf16.msrb.mxu0 %v389_v6 }
  0x4c   : > { %1035 = vmatmul.msk.bf16.vlgmr.msrb.gmra.mxu3 %vm408_vm0, %v1174_v25  ;;  %704 = vmatpush.bf16.msrb.mxu2 %v391_v4  ;;  %v366_v4 = vpack.c.bf16 %v270_v0, %v238_v63 }
  0x4d   : > { %717 = vmatpush.bf16.msrb.mxu3 %v392_v5  ;;  %691 = vmatpush.bf16.msrb.mxu1 %v390_v10 }
  0x4f   : > { %679 = vmatpush.bf16.msrb.mxu0 %v357_v18 }
  0x50   : > { %705 = vmatpush.bf16.msrb.mxu2 %v359_v16 }
  0x51   : > { %718 = vmatpush.bf16.msrb.mxu3 %v360_v17  ;;  %692 = vmatpush.bf16.msrb.mxu1 %v358_v19 }
  0x5a   : > { %1036 = vmatmul.msk.bf16.vlgmr.msra.gmra.mxu0 %vm408_vm0, %v1174_v25  ;;  %1037 = vmatmul.msk.bf16.vlgmr.msra.gmra.mxu1 %vm408_vm0, %v1174_v25 }
  0x5b   : > { %1038 = vmatmul.msk.bf16.vlgmr.msra.gmra.mxu2 %vm408_vm0, %v1174_v25  ;;  %730 = vmatpush.bf16.msra.mxu0 %v393_v31 }
  0x5c   : > { %1039 = vmatmul.msk.bf16.vlgmr.msra.gmra.mxu3 %vm408_vm0, %v1174_v25  ;;  %756 = vmatpush.bf16.msra.mxu2 %v395_v29 }
  0x5d   : > { %769 = vmatpush.bf16.msra.mxu3 %v396_v30  ;;  %743 = vmatpush.bf16.msra.mxu1 %v394_v35 }
  0x5f   : > { %731 = vmatpush.bf16.msra.mxu0 %v361_v43 }
  0x60   : > { %757 = vmatpush.bf16.msra.mxu2 %v363_v41 }
  0x61   : > { %770 = vmatpush.bf16.msra.mxu3 %v364_v42  ;;  %744 = vmatpush.bf16.msra.mxu1 %v362_v44 }
  0x6a   : > { %1040 = vmatmul.msk.bf16.vlgmr.msrb.gmra.mxu0 %vm408_vm0, %v1174_v25  ;;  %1041 = vmatmul.msk.bf16.vlgmr.msrb.gmra.mxu1 %vm408_vm0, %v1174_v25 }
  0x6b   : > { %1042 = vmatmul.msk.bf16.vlgmr.msrb.gmra.mxu2 %vm408_vm0, %v1174_v25  ;;  %782 = vmatpush.bf16.msrb.mxu0 %v397_v55 }
  0x6c   : > { %1043 = vmatmul.msk.bf16.vlgmr.msrb.gmra.mxu3 %vm408_vm0, %v1174_v25  ;;  %808 = vmatpush.bf16.msrb.mxu2 %v399_v53 }
  0x6d   : > { %821 = vmatpush.bf16.msrb.mxu3 %v400_v54  ;;  %795 = vmatpush.bf16.msrb.mxu1 %v398_v59 }
  0x6f   : > { %783 = vmatpush.bf16.msrb.mxu0 %v365_v3 }
  0x70   : > { %809 = vmatpush.bf16.msrb.mxu2 %v367_v1 }
  0x71   : > { %822 = vmatpush.bf16.msrb.mxu3 %v368_v2  ;;  %796 = vmatpush.bf16.msrb.mxu1 %v366_v4 }
  0x7a   : > { %1044 = vmatmul.msk.bf16.vlgmr.msra.gmra.mxu0 %vm408_vm0, %v1174_v25  ;;  %1045 = vmatmul.msk.bf16.vlgmr.msra.gmra.mxu1 %vm408_vm0, %v1174_v25 }
  0x7b   : > { %1046 = vmatmul.msk.bf16.vlgmr.msra.gmra.mxu2 %vm408_vm0, %v1174_v25 }
  0x7c   : > { %1047 = vmatmul.msk.bf16.vlgmr.msra.gmra.mxu3 %vm408_vm0, %v1174_v25 }
  0x80   : > { %v1352_v15 = vpop.permute.xlu0 %405 }
  0x8a   : > { %1048 = vmatmul.msk.bf16.vlgmr.msrb.gmra.mxu0 %vm408_vm0, %v1174_v25  ;;  %1049 = vmatmul.msk.bf16.vlgmr.msrb.gmra.mxu1 %vm408_vm0, %v1174_v25 }
  0x8b   : > { %1050 = vmatmul.msk.bf16.vlgmr.msrb.gmra.mxu2 %vm408_vm0, %v1174_v25 }
  0x8c   : > { %1051 = vmatmul.msk.bf16.vlgmr.msrb.gmra.mxu3 %vm408_vm0, %v1174_v25 }
  0x97   : > { %v421_v5 = vpop.f32.mrf.mxu0  ;;  %v434_v6 = vpop.f32.mrf.mxu1 }
  0x98   : > { %v435_v19 = vadd.f32 %v434_v6, %v1352_v15  ;;  %v422_v29 = vadd.f32 %v421_v5, %v1352_v15 }
  0x9a   : > { %v860_v30 = vrot.slane %v435_v19, 7 }
  0x9c   : > { %v889_v37 = vsel %vm888_vm3, %v422_v29, %v860_v30 }
  0x9e   : > { %v447_v7 = vpop.f32.mrf.mxu2 }
  0x9f   : > { %v460_v8 = vpop.f32.mrf.mxu3  ;;  %v423_v9 = vpop.f32.mrf.mxu0  ;;  %v448_v16 = vadd.f32 %v447_v7, %v1352_v15 }
  0xa0   : > { %v436_v10 = vpop.f32.mrf.mxu1  ;;  %v461_v17 = vadd.f32 %v460_v8, %v1352_v15 }
  0xa1   : > { %v861_v20 = vrot.slane %v448_v16, 6 }
  0xa2   : > { %v862_v21 = vrot.slane %v461_v17, 5 }
  0xa4   : > { %v891_v34 = vsel %vm890_vm1, %v861_v20, %v862_v21 }
  0xa5   : > { %v893_v39 = vsel %vm892_vm4, %v889_v37, %v891_v34 }
  0xa6   : > { %v449_v11 = vpop.f32.mrf.mxu2 }
  0xa7   : > { %v462_v12 = vpop.f32.mrf.mxu3  ;;  %v473_v13 = vpop.f32.mrf.mxu0 }
  0xa8   : > { %v486_v14 = vpop.f32.mrf.mxu1  ;;  %v474_v18 = vadd.f32 %v473_v13, %v1352_v15 }
  0xa9   : > { %v487_v25 = vadd.f32 %v486_v14, %v1352_v15 }
  0xaa   : > { %v863_v22 = vrot.slane %v474_v18, 4 }
  0xab   : > { %v864_v23 = vrot.slane %v487_v25, 3 }
  0xad   : > { %v895_v35 = vsel %vm894_vm2, %v863_v22, %v864_v23 }
  0xae   : > { %v499_v24 = vpop.f32.mrf.mxu2 }
  0xaf   : > { %v500_v26 = vadd.f32 %v499_v24, %v1352_v15  ;;  %v512_v27 = vpop.f32.mrf.mxu3  ;;  %v475_v28 = vpop.f32.mrf.mxu0 }
  0xb0   : > { %v513_v31 = vadd.f32 %v512_v27, %v1352_v15  ;;  %v488_v32 = vpop.f32.mrf.mxu1 }
  0xb1   : > { %v865_v33 = vrot.slane %v500_v26, 2 }
  0xb2   : > { %v866_v36 = vrot.slane %v513_v31, 1 }
  0xb4   : > { %v897_v38 = vsel %vm896_vm5, %v865_v33, %v866_v36 }
  0xb5   : > { %v899_v40 = vsel %vm898_vm6, %v895_v35, %v897_v38 }
  0xb6   : > { %v901_v41 = vsel %vm900_vm7, %v893_v39, %v899_v40  ;;  %v501_v42 = vpop.f32.mrf.mxu2 }
  0xb7   : > { %927 = vst [vmem:[%s1369_s27] sm:$0xff] %v901_v41  ;;  %v514_v43 = vpop.f32.mrf.mxu3  ;;  %v525_v44 = vpop.f32.mrf.mxu0 }
  0xb8   : > { %v538_v45 = vpop.f32.mrf.mxu1  ;;  %v526_v3 = vadd.f32 %v525_v44, %v1352_v15 }
  0xb9   : > { %v539_v58 = vadd.f32 %v538_v45, %v1352_v15 }
  0xbb   : > { %v867_v4 = vrot.slane %v539_v58, 7 }
  0xbd   : > { %v902_v11 = vsel %vm888_vm3, %v526_v3, %v867_v4 }
  0xbe   : > { %v551_v46 = vpop.f32.mrf.mxu2 }
  0xbf   : > { %v564_v47 = vpop.f32.mrf.mxu3  ;;  %v527_v48 = vpop.f32.mrf.mxu0  ;;  %v552_v54 = vadd.f32 %v551_v46, %v1352_v15 }
  0xc0   : > { %v540_v49 = vpop.f32.mrf.mxu1  ;;  %v565_v55 = vadd.f32 %v564_v47, %v1352_v15 }
  0xc1   : > { %v868_v59 = vrot.slane %v552_v54, 6 }
  0xc2   : > { %v869_v60 = vrot.slane %v565_v55, 5 }
  0xc4   : > { %v903_v8 = vsel %vm890_vm1, %v868_v59, %v869_v60 }
  0xc5   : > { %v904_v13 = vsel %vm892_vm4, %v902_v11, %v903_v8 }
  0xc6   : > { %v553_v50 = vpop.f32.mrf.mxu2 }
  0xc7   : > { %v566_v51 = vpop.f32.mrf.mxu3  ;;  %v577_v52 = vpop.f32.mrf.mxu0 }
  0xc8   : > { %v590_v53 = vpop.f32.mrf.mxu1  ;;  %v578_v56 = vadd.f32 %v577_v52, %v1352_v15 }
  0xc9   : > { %v591_v57 = vadd.f32 %v590_v53, %v1352_v15 }
  0xca   : > { %v870_v61 = vrot.slane %v578_v56, 4 }
  0xcb   : > { %v871_v62 = vrot.slane %v591_v57, 3 }
  0xcd   : > { %v905_v9 = vsel %vm894_vm2, %v870_v61, %v871_v62 }
  0xce   : > { %v603_v63 = vpop.f32.mrf.mxu2 }
  0xcf   : > { %v604_v0 = vadd.f32 %v603_v63, %v1352_v15  ;;  %v616_v1 = vpop.f32.mrf.mxu3  ;;  %v579_v2 = vpop.f32.mrf.mxu0 }
  0xd0   : > { %v617_v5 = vadd.f32 %v616_v1, %v1352_v15  ;;  %v592_v6 = vpop.f32.mrf.mxu1 }
  0xd1   : > { %v872_v7 = vrot.slane %v604_v0, 2 }
  0xd2   : > { %v873_v10 = vrot.slane %v617_v5, 1 }
  0xd4   : > { %v906_v12 = vsel %vm896_vm5, %v872_v7, %v873_v10 }
  0xd5   : > { %v907_v14 = vsel %vm898_vm6, %v905_v9, %v906_v12 }
  0xd6   : > { %v908_v16 = vsel %vm900_vm7, %v904_v13, %v907_v14  ;;  %v605_v17 = vpop.f32.mrf.mxu2 }
  0xd7   : > { %928 = vst [vmem:[%s1369_s27 + $0x8] sm:$0xff] %v908_v16  ;;  %v618_v18 = vpop.f32.mrf.mxu3  ;;  %v629_v25 = vpop.f32.mrf.mxu0 }
  0xd8   : > { %v642_v19 = vpop.f32.mrf.mxu1  ;;  %v630_v42 = vadd.f32 %v629_v25, %v1352_v15 }
  0xd9   : > { %v643_v33 = vadd.f32 %v642_v19, %v1352_v15 }
  0xdb   : > { %v874_v43 = vrot.slane %v643_v33, 7 }
  0xdd   : > { %v909_v50 = vsel %vm888_vm3, %v630_v42, %v874_v43 }
  0xde   : > { %v655_v20 = vpop.f32.mrf.mxu2 }
  0xdf   : > { %v668_v21 = vpop.f32.mrf.mxu3  ;;  %v631_v22 = vpop.f32.mrf.mxu0  ;;  %v656_v29 = vadd.f32 %v655_v20, %v1352_v15 }
  0xe0   : > { %v644_v23 = vpop.f32.mrf.mxu1  ;;  %v669_v30 = vadd.f32 %v668_v21, %v1352_v15 }
  0xe1   : > { %v875_v34 = vrot.slane %v656_v29, 6 }
  0xe2   : > { %v876_v35 = vrot.slane %v669_v30, 5 }
  0xe4   : > { %v910_v47 = vsel %vm890_vm1, %v875_v34, %v876_v35 }
  0xe5   : > { %v911_v52 = vsel %vm892_vm4, %v909_v50, %v910_v47 }
  0xe6   : > { %v657_v24 = vpop.f32.mrf.mxu2 }
  0xe7   : > { %v670_v26 = vpop.f32.mrf.mxu3  ;;  %v681_v27 = vpop.f32.mrf.mxu0 }
  0xe8   : > { %v694_v28 = vpop.f32.mrf.mxu1  ;;  %v682_v31 = vadd.f32 %v681_v27, %v1352_v15 }
  0xe9   : > { %v695_v32 = vadd.f32 %v694_v28, %v1352_v15 }
  0xea   : > { %v877_v36 = vrot.slane %v682_v31, 4 }
  0xeb   : > { %v878_v37 = vrot.slane %v695_v32, 3 }
  0xed   : > { %v912_v48 = vsel %vm894_vm2, %v877_v36, %v878_v37 }
  0xee   : > { %v707_v38 = vpop.f32.mrf.mxu2 }
  0xef   : > { %v708_v39 = vadd.f32 %v707_v38, %v1352_v15  ;;  %v720_v40 = vpop.f32.mrf.mxu3  ;;  %v683_v41 = vpop.f32.mrf.mxu0 }
  0xf0   : > { %v721_v44 = vadd.f32 %v720_v40, %v1352_v15  ;;  %v696_v45 = vpop.f32.mrf.mxu1 }
  0xf1   : > { %v879_v46 = vrot.slane %v708_v39, 2 }
  0xf2   : > { %v880_v49 = vrot.slane %v721_v44, 1 }
  0xf4   : > { %v913_v51 = vsel %vm896_vm5, %v879_v46, %v880_v49 }
  0xf5   : > { %v914_v53 = vsel %vm898_vm6, %v912_v48, %v913_v51 }
  0xf6   : > { %v915_v54 = vsel %vm900_vm7, %v911_v52, %v914_v53  ;;  %v709_v55 = vpop.f32.mrf.mxu2 }
  0xf7   : > { %929 = vst [vmem:[%s1369_s27 + $0x10] sm:$0xff] %v915_v54  ;;  %v722_v56 = vpop.f32.mrf.mxu3  ;;  %v733_v57 = vpop.f32.mrf.mxu0 }
  0xf8   : > { %v746_v58 = vpop.f32.mrf.mxu1  ;;  %v734_v17 = vadd.f32 %v733_v57, %v1352_v15 }
  0xf9   : > { %v747_v7 = vadd.f32 %v746_v58, %v1352_v15 }
  0xfb   : > { %v881_v18 = vrot.slane %v747_v7, 7 }
  0xfd   : > { %v916_v24 = vsel %vm888_vm3, %v734_v17, %v881_v18 }
  0xfe   : > { %v759_v59 = vpop.f32.mrf.mxu2 }
  0xff   : > { %v772_v60 = vpop.f32.mrf.mxu3  ;;  %v735_v61 = vpop.f32.mrf.mxu0  ;;  %v760_v3 = vadd.f32 %v759_v59, %v1352_v15 }
 0x100   : > { %v748_v62 = vpop.f32.mrf.mxu1  ;;  %v773_v4 = vadd.f32 %v772_v60, %v1352_v15 }
 0x101   : > { %v882_v8 = vrot.slane %v760_v3, 6 }
 0x102   : > { %v883_v9 = vrot.slane %v773_v4, 5 }
 0x104   : > { %v917_v21 = vsel %vm890_vm1, %v882_v8, %v883_v9 }
 0x105   : > { %v918_v27 = vsel %vm892_vm4, %v916_v24, %v917_v21 }
 0x106   : > { %v761_v63 = vpop.f32.mrf.mxu2 }
 0x107   : > { %v774_v0 = vpop.f32.mrf.mxu3  ;;  %v785_v1 = vpop.f32.mrf.mxu0 }
 0x108   : > { %v798_v2 = vpop.f32.mrf.mxu1  ;;  %v786_v5 = vadd.f32 %v785_v1, %v1352_v15 }
 0x109   : > { %v799_v6 = vadd.f32 %v798_v2, %v1352_v15 }
 0x10a   : > { %v884_v10 = vrot.slane %v786_v5, 4 }
 0x10b   : > { %v885_v11 = vrot.slane %v799_v6, 3 }
 0x10d   : > { %v919_v22 = vsel %vm894_vm2, %v884_v10, %v885_v11 }
 0x10e   : > { %v811_v12 = vpop.f32.mrf.mxu2 }
 0x10f   : > { %v812_v13 = vadd.f32 %v811_v12, %v1352_v15  ;;  %v824_v14 = vpop.f32.mrf.mxu3  ;;  %v787_v16 = vpop.f32.mrf.mxu0 }
 0x110   : > { %v825_v25 = vadd.f32 %v824_v14, %v1352_v15  ;;  %v800_v19 = vpop.f32.mrf.mxu1 }
 0x111   : > { %v886_v20 = vrot.slane %v812_v13, 2 }
 0x112   : > { %v887_v23 = vrot.slane %v825_v25, 1 }
 0x114   : > { %v920_v26 = vsel %vm896_vm5, %v886_v20, %v887_v23 }
 0x115   : > { %v921_v28 = vsel %vm898_vm6, %v919_v22, %v920_v26 }
 0x116   : > { %v922_v29 = vsel %vm900_vm7, %v918_v27, %v921_v28  ;;  %v813_v30 = vpop.f32.mrf.mxu2 }
 0x117   : > { %930 = vst [vmem:[%s1369_s27 + $0x18] sm:$0xff] %v922_v29  ;;  %v826_v15 = vpop.f32.mrf.mxu3 }
 0x118 PF: > { %s13_s14 = sadd.s32 1, %s1103_s14   ;;  %s1437_s12 = smov %s1099_s13 }
 0x119   : > { %p10_p5 = scmp.ge.s32.totalorder %s13_s14, 4   ;;  %s1438_s13 = smov %s1440_s15 }
 0x11b   :  { %12 = sbr.rel (!%p10_p5) target bundleno = 2 (0x2), region = 62 }

</bundles_post_ra>
